<compile_context>
chip_gen: v7x
topology: tpu7x:2x2x1
jax: 0.10.0
libtpu: 0.0.40
codegen_flags: <defaults>
</compile_context>

<pallas_src>
import jax
import jax.numpy as jnp
from jax import lax
from jax.experimental import pallas as pl
from jax.experimental.pallas import tpu as pltpu
import numpy as np


def labels_kernel(alpha_ref, x_ref, gamma_ref, out_ref):
    """Fused compute_labels() in real arithmetic.

    alpha_ref: (a_t, dim) f32   tile of alpha samples
    x_ref:     (n, dim)  f32    exponent == multiplier_numerator == X
    gamma_ref: (n, m)    f32    gamma_numerator == gamma_denominator == gamma_X
    out_ref:   (2, a_t, m*dim) f32   [0]=Re(labels), [1]=Im(labels); lane index = d*m + z
    """
    alpha = alpha_ref[...]                      # (a_t, dim)
    X = x_ref[...]                              # (n, dim)
    gamma = gamma_ref[...]                      # (n, m)
    a_t, dim = alpha.shape
    n, m = gamma.shape

    # theta[a, j] = sum_d alpha[a, d] * X[j, d]   (== alpha @ X.T)
    theta = lax.dot_general(
        alpha, X, (((1,), (1,)), ((), ())),
        preferred_element_type=jnp.float32)     # (a_t, n)
    cos_t = jnp.cos(theta)                      # Re(exps)
    sin_t = jnp.sin(theta)                      # Im(exps)

    # Single fused MXU matmul replacing 2 + 2*dim sub-MXU-pass dots:
    #   G = [gamma | gamma*X[:,0] | ... | gamma*X[:,dim-1]]      (n, m*(dim+1))
    #   S = [cos_t ; sin_t]                                      (2*a_t, n)
    #   R = S @ G                                                (2*a_t, m*(dim+1))
    G = jnp.concatenate(
        [gamma] + [gamma * X[:, d:d + 1] for d in range(dim)], axis=1)
    S = jnp.concatenate([cos_t, sin_t], axis=0)
    R = jnp.dot(S, G, preferred_element_type=jnp.float32)

    denom_r = R[:a_t, :m]                       # (a_t, m)      Re(exps @ gamma)
    denom_i = R[a_t:, :m]                       # (a_t, m)      Im(exps @ gamma)
    num_r = R[:a_t, m:]                         # (a_t, m*dim)  column index d*m + z
    num_i = R[a_t:, m:]                         # (a_t, m*dim)

    dd = denom_r * denom_r + denom_i * denom_i
    # Exact reciprocal keeps rtol=1e-4; switch to approx=True (EUP slot) if the
    # accuracy budget allows.
    inv_dd = pl.reciprocal(dd, approx=False)    # (a_t, m)

    # Broadcast the denominator across the m*dim lane slab ONCE (vectorized epilogue).
    dr = jnp.tile(denom_r, (1, dim))            # (a_t, m*dim)
    di = jnp.tile(denom_i, (1, dim))
    inv = jnp.tile(inv_dd, (1, dim))

    # complex division: (num_r + i*num_i) / (denom_r + i*denom_i)
    out_r = (num_r * dr + num_i * di) * inv
    out_i = (num_i * dr - num_r * di) * inv

    out_ref[...] = jnp.stack([out_r, out_i], axis=0)   # one lane-dense store


def compute_labels_pallas(alpha, X, gamma, a_tile=None):
    a, dim = alpha.shape
    n, m = gamma.shape
    if a_tile is None:
        a_tile = a if a <= 256 else 256         # grid-ready for large a (v7x 2 TCs)
    assert a % a_tile == 0, "alpha-sample count must be divisible by a_tile"
    grid = (a // a_tile,)

    cost = pl.CostEstimate(
        flops=2 * a * n * dim                       # theta
        + 2 * (2 * a) * n * (m * (dim + 1))         # fused matmul
        + 10 * a * m * dim,                         # epilogue elementwise
        transcendentals=2 * a * n,                  # cos + sin
        bytes_accessed=4 * (a * dim + n * dim + n * m + 2 * a * m * dim),
    )

    out = pl.pallas_call(
        labels_kernel,
        out_shape=jax.ShapeDtypeStruct((2, a, m * dim), jnp.float32),
        grid=grid,
        in_specs=[
            pl.BlockSpec((a_tile, dim), lambda i: (i, 0)),   # alpha tile
            pl.BlockSpec((n, dim), lambda i: (0, 0)),        # X (full)
            pl.BlockSpec((n, m), lambda i: (0, 0)),          # gamma (full)
        ],
        out_specs=pl.BlockSpec((2, a_tile, m * dim), lambda i: (0, i, 0)),
        compiler_params=pltpu.CompilerParams(dimension_semantics=("parallel",)),
        cost_estimate=cost,
    )(alpha, X, gamma)

    # (2, a, m*dim) -> complex (a, m, dim) in the wrapper (free XLA layout plumbing).
    out_r = jnp.transpose(out[0].reshape(a, dim, m), (0, 2, 1))
    out_i = jnp.transpose(out[1].reshape(a, dim, m), (0, 2, 1))
    return lax.complex(out_r, out_i)


def xmodel_forward(X, log_lambda_X, K_Z1Z1, K_Z1Z2, alpha_samples):
    n = K_Z1Z1.shape[0]
    # TODO(synk): dense LU linear solve has no clean Pallas equivalent; kept as plain-JAX glue.
    A = K_Z1Z1 + n * jnp.exp(log_lambda_X)[0] * jnp.eye(n, dtype=K_Z1Z1.dtype)
    gamma_X = jnp.linalg.solve(A, K_Z1Z2)
    return compute_labels_pallas(alpha_samples, X, gamma_X)


def compute_labels_ref(alpha, X, gamma):
    """Pure-JAX reference (real arithmetic) mirroring XModel.compute_labels."""
    theta = alpha @ X.T
    cos_t, sin_t = jnp.cos(theta), jnp.sin(theta)
    dr = cos_t @ gamma
    di = sin_t @ gamma
    nr = jnp.einsum('jd,jz,aj->azd', X, gamma, cos_t)
    ni = jnp.einsum('jd,jz,aj->azd', X, gamma, sin_t)
    dd = dr ** 2 + di ** 2
    outr = (nr * dr[..., None] + ni * di[..., None]) / dd[..., None]
    outi = (ni * dr[..., None] - nr * di[..., None]) / dd[..., None]
    return lax.complex(outr, outi)


if __name__ == "__main__":
    # Small shapes implied by the module:
    #   K_Z1Z1: (n, n), K_Z1Z2: (n, m), M/N/X: (n, dim), alpha_samples: (a, dim)
    n, m, a, dim = 16, 8, 8, 4
    key = jax.random.PRNGKey(0)
    kM, kN, kA, kK2, kAl = jax.random.split(key, 5)

    M = jax.random.normal(kM, (n, dim), jnp.float32)
    N = jax.random.normal(kN, (n, dim), jnp.float32)
    A0 = jax.random.normal(kA, (n, n), jnp.float32)
    K_Z1Z1 = A0 @ A0.T / n + jnp.eye(n, dtype=jnp.float32)   # SPD kernel matrix
    K_Z1Z2 = jax.random.normal(kK2, (n, m), jnp.float32)
    alpha_samples = jax.random.normal(kAl, (a, dim), jnp.float32)
    lambda_N = 0.05

    # Parameters, initialized exactly as in XModel.__init__
    X = (M + N) / 2.0                                           # self.X
    log_lambda_X = jnp.log(jnp.array([lambda_N], jnp.float32))  # self.log_lambda_X

    out = xmodel_forward(X, log_lambda_X, K_Z1Z1, K_Z1Z2, alpha_samples)
    out = jax.block_until_ready(out)
    assert out.shape == (a, m, dim) and out.dtype == jnp.complex64

    # Correctness check against pure-JAX reference.
    A_reg = K_Z1Z1 + n * jnp.exp(log_lambda_X)[0] * jnp.eye(n, dtype=jnp.float32)
    gamma_X = jnp.linalg.solve(A_reg, K_Z1Z2)
    ref = compute_labels_ref(alpha_samples, X, gamma_X)
    np.testing.assert_allclose(np.asarray(out), np.asarray(ref), rtol=1e-4, atol=1e-4)

    print("KERNEL_OK")
</pallas_src>

<mosaic_0001>
module attributes {stable_mosaic.version = 11 : i64} {
  func.func @labels_kernel(%arg0: i32, %arg1: memref<8x4xf32, #tpu.memory_space<vmem>>, %arg2: memref<16x4xf32, #tpu.memory_space<vmem>>, %arg3: memref<16x8xf32, #tpu.memory_space<vmem>>, %arg4: memref<2x8x32xf32, #tpu.memory_space<vmem>>) attributes {dimension_semantics = [#tpu.dimension_semantics<parallel>], iteration_bounds = array<i64: 1>, scalar_prefetch = 0 : i64, scratch_operands = 0 : i64, tpu.core_type = #tpu.core_type<tc>, window_params = [{transform_indices = @transform_0, window_bounds = array<i64: 8, 4>}, {pipeline_mode = #tpu.pipeline_mode<synchronous>, transform_indices = @transform_1, window_bounds = array<i64: 16, 4>}, {pipeline_mode = #tpu.pipeline_mode<synchronous>, transform_indices = @transform_2, window_bounds = array<i64: 16, 8>}, {transform_indices = @transform_3, window_bounds = array<i64: 2, 8, 32>}]} {
    %c0 = arith.constant 0 : index
    %c0_0 = arith.constant 0 : index
    %0 = vector.load %arg1[%c0, %c0_0] : memref<8x4xf32, #tpu.memory_space<vmem>>, vector<8x4xf32>
    %c0_1 = arith.constant 0 : index
    %c0_2 = arith.constant 0 : index
    %1 = vector.load %arg2[%c0_1, %c0_2] : memref<16x4xf32, #tpu.memory_space<vmem>>, vector<16x4xf32>
    %c0_3 = arith.constant 0 : index
    %c0_4 = arith.constant 0 : index
    %2 = vector.load %arg3[%c0_3, %c0_4] : memref<16x8xf32, #tpu.memory_space<vmem>>, vector<16x8xf32>
    %cst = arith.constant dense<0.000000e+00> : vector<8x16xf32>
    %3 = tpu.matmul %0, %1, %cst {dimension_numbers = #tpu.dot_dimension_numbers<[1], [1], [0], [0], [0, 0, 1, 0], [], []>} : vector<8x4xf32>, vector<16x4xf32>, vector<8x16xf32> -> vector<8x16xf32>
    %4 = math.cos %3 : vector<8x16xf32>
    %5 = math.sin %3 : vector<8x16xf32>
    %6 = vector.extract_strided_slice %1 {offsets = [0, 0], sizes = [16, 1], strides = [1, 1]} : vector<16x4xf32> to vector<16x1xf32>
    %7 = vector.broadcast %6 : vector<16x1xf32> to vector<16x8xf32>
    %8 = arith.mulf %2, %7 : vector<16x8xf32>
    %9 = vector.extract_strided_slice %1 {offsets = [0, 1], sizes = [16, 1], strides = [1, 1]} : vector<16x4xf32> to vector<16x1xf32>
    %10 = vector.broadcast %9 : vector<16x1xf32> to vector<16x8xf32>
    %11 = arith.mulf %2, %10 : vector<16x8xf32>
    %12 = vector.extract_strided_slice %1 {offsets = [0, 2], sizes = [16, 1], strides = [1, 1]} : vector<16x4xf32> to vector<16x1xf32>
    %13 = vector.broadcast %12 : vector<16x1xf32> to vector<16x8xf32>
    %14 = arith.mulf %2, %13 : vector<16x8xf32>
    %15 = vector.extract_strided_slice %1 {offsets = [0, 3], sizes = [16, 1], strides = [1, 1]} : vector<16x4xf32> to vector<16x1xf32>
    %16 = vector.broadcast %15 : vector<16x1xf32> to vector<16x8xf32>
    %17 = arith.mulf %2, %16 : vector<16x8xf32>
    %18 = tpu.concatenate %2, %8, %11, %14, %17 in 1 : vector<16x8xf32>, vector<16x8xf32>, vector<16x8xf32>, vector<16x8xf32>, vector<16x8xf32> -> vector<16x40xf32>
    %19 = tpu.concatenate %4, %5 in 0 : vector<8x16xf32>, vector<8x16xf32> -> vector<16x16xf32>
    %cst_5 = arith.constant dense<0.000000e+00> : vector<16x40xf32>
    %20 = tpu.matmul %19, %18, %cst_5 {dimension_numbers = #tpu.dot_dimension_numbers<[1], [0], [0], [1], [0, 0, 1, 1], [], []>} : vector<16x16xf32>, vector<16x40xf32>, vector<16x40xf32> -> vector<16x40xf32>
    %21 = vector.extract_strided_slice %20 {offsets = [0, 0], sizes = [8, 8], strides = [1, 1]} : vector<16x40xf32> to vector<8x8xf32>
    %22 = vector.extract_strided_slice %20 {offsets = [8, 0], sizes = [8, 8], strides = [1, 1]} : vector<16x40xf32> to vector<8x8xf32>
    %23 = vector.extract_strided_slice %20 {offsets = [0, 8], sizes = [8, 32], strides = [1, 1]} : vector<16x40xf32> to vector<8x32xf32>
    %24 = vector.extract_strided_slice %20 {offsets = [8, 8], sizes = [8, 32], strides = [1, 1]} : vector<16x40xf32> to vector<8x32xf32>
    %25 = arith.mulf %21, %21 : vector<8x8xf32>
    %26 = arith.mulf %22, %22 : vector<8x8xf32>
    %27 = arith.addf %25, %26 : vector<8x8xf32>
    %28 = tpu.reciprocal %27 : vector<8x8xf32> -> vector<8x8xf32>
    %29 = tpu.concatenate %21, %21, %21, %21 in 1 : vector<8x8xf32>, vector<8x8xf32>, vector<8x8xf32>, vector<8x8xf32> -> vector<8x32xf32>
    %30 = tpu.concatenate %22, %22, %22, %22 in 1 : vector<8x8xf32>, vector<8x8xf32>, vector<8x8xf32>, vector<8x8xf32> -> vector<8x32xf32>
    %31 = tpu.concatenate %28, %28, %28, %28 in 1 : vector<8x8xf32>, vector<8x8xf32>, vector<8x8xf32>, vector<8x8xf32> -> vector<8x32xf32>
    %32 = arith.mulf %23, %29 : vector<8x32xf32>
    %33 = arith.mulf %24, %30 : vector<8x32xf32>
    %34 = arith.addf %32, %33 : vector<8x32xf32>
    %35 = arith.mulf %34, %31 : vector<8x32xf32>
    %36 = arith.mulf %24, %29 : vector<8x32xf32>
    %37 = arith.mulf %23, %30 : vector<8x32xf32>
    %38 = arith.subf %36, %37 : vector<8x32xf32>
    %39 = arith.mulf %38, %31 : vector<8x32xf32>
    %40 = vector.shape_cast %35 : vector<8x32xf32> to vector<1x8x32xf32>
    %41 = vector.shape_cast %39 : vector<8x32xf32> to vector<1x8x32xf32>
    %42 = tpu.concatenate %40, %41 in 0 : vector<1x8x32xf32>, vector<1x8x32xf32> -> vector<2x8x32xf32>
    %c0_6 = arith.constant 0 : index
    %c0_7 = arith.constant 0 : index
    %c0_8 = arith.constant 0 : index
    %43 = vector.load %arg4[%c0_6, %c0_7, %c0_8] : memref<2x8x32xf32, #tpu.memory_space<vmem>>, vector<2x8x32xf32>
    tpu.vector_store %arg4[%c0_6, %c0_7, %c0_8], %42 {strides = array<i32>} : memref<2x8x32xf32, #tpu.memory_space<vmem>>, vector<2x8x32xf32>,
    return
  }
  func.func @transform_0(%arg0: i32) -> (i32, i32) {
    %c0_i32 = arith.constant 0 : i32
    %c0_i32_0 = arith.constant 0 : i32
    return %arg0, %c0_i32 : i32, i32
  }
  func.func @transform_1(%arg0: i32) -> (i32, i32) {
    %c0_i32 = arith.constant 0 : i32
    %c0_i32_0 = arith.constant 0 : i32
    %c0_i32_1 = arith.constant 0 : i32
    return %c0_i32, %c0_i32_0 : i32, i32
  }
  func.func @transform_2(%arg0: i32) -> (i32, i32) {
    %c0_i32 = arith.constant 0 : i32
    %c0_i32_0 = arith.constant 0 : i32
    %c0_i32_1 = arith.constant 0 : i32
    return %c0_i32, %c0_i32_0 : i32, i32
  }
  func.func @transform_3(%arg0: i32) -> (i32, i32, i32) {
    %c0_i32 = arith.constant 0 : i32
    %c0_i32_0 = arith.constant 0 : i32
    %c0_i32_1 = arith.constant 0 : i32
    return %c0_i32, %arg0, %c0_i32_0 : i32, i32, i32
  }
}

</mosaic_0001>

<bundles_post_ra>
// kernel: tpu_custom_call.1
= control target key start
LH: loop header
LB: loop body
LE: loop exit
PB: predicated region body
PF: predicated region fallthrough
CT: control target
= control target key end

     0   :  { %vm20_vm0 = vcmask 31744   ;;  %v683_v2 = vmov 0.0|0.0   ;;  %vm684_vm2 = vmmov 0   ;;  %v685_v4 = vmov 0.0   ;;  %s825_s0 = inlined_call_operand.vmem [shape: f32[8,4], index: 0, kind: input, shape index: {}]   ;;  %s826_s1 = inlined_call_operand.vmem [shape: f32[16,4], index: 1, kind: input, shape index: {}]   ;;  %s827_s2 = inlined_call_operand.vmem [shape: f32[16,8], index: 2, kind: input, shape index: {}]   ;;  %s828_s3 = inlined_call_operand.hbm [shape: f32[2,8,32], index: 3, kind: output, shape index: {}]  }
   0x1   :  { %v16_v0 = vld [vmem:[%s826_s1] sm:$0xff]  ;;  %v17_v1 = vld [vmem:[%s826_s1 + $0x8] sm:$0xff]  ;;  %595 = vmatprep.subr.bf16.mxu0 %v683_v2  ;;  %vm597_vm1 = vmpackc.low %vm20_vm0, %vm20_vm0  ;;  %585 = vmatprep.mubr.msk.f32.mxu0 %vm684_vm2, %v685_v4  ;;  %v686_v5 = vmov 1   ;;  %v687_v6 = vmov 0  }
   0x2   :  { %v596_v3 = vpack.c.bf16 %v17_v1, %v16_v0  ;;  %628 = vset.pattern.permute.xlu1 %v686_v5  ;;  %627 = vset.pattern.permute.xlu0 %v687_v6 }
   0x3   :  { %8 = vsyncpa [#allocation3], 0  ;;  %318 = vperm.xlu1 %628, %v16_v0   ;;  %308 = vperm.xlu0 %627, %v16_v0   ;;  %v15_v7 = vld [vmem:[%s825_s0] sm:$0xff]  ;;  %v688_v8 = vmov 2   ;;  %v689_v9 = vmov 3   ;;  %v743_v13 = vld [vmem:[%s827_s2 + $0x8] sm:$0xff] }
   0x4   :  { %598 = vmatpush3.bf16.xpose.msk.msra.mxu0 %vm597_vm1, %v596_v3  ;;  %v738_v11 = vld [vmem:[%s827_s2] sm:$0xff]  ;;  %s690_s20 = smov 8   ;;  %s691_s2 = smov 16   ;;  %v694_v44 = vmov 683565275   ;;  %vm379_vm9 = vcmask 64512  }
   0x5   :  { %s692_s21 = smov 24   ;;  %s693_s22 = smov 32   ;;  %v695_v46 = vmov 2475754826   ;;  %v696_v49 = vmov 2131351028  }
   0x6   :  { %v697_v52 = vmov 2102212464   ;;  %v698_v55 = vmov 920167782   ;;  %v699_v58 = vmov 1326507024  }
   0x7   :  { %322 = vperm.xlu1 %628, %v17_v1   ;;  %312 = vperm.xlu0 %627, %v17_v1   ;;  %vm382_vm10 = vcmask 130048   ;;  %vm385_vm11 = vcmask 195584   ;;  %vm388_vm12 = vcmask 261120   ;;  %s700_s23 = smov 120   ;;  %s701_s24 = smov [#allocation2]  }
   0x8   :  { %s550_s25 = sshll.u32 %s701_s24, 4  ;;  %s551_s25 = int_to_ptr.vmem [resolvable:$true] %s550_s25 }
   0x9   :  { %s659_s26 = scalar_lea.vmem %s551_s25, 256  ;;  %p664_p1 = scmp.lt.s32.totalorder %s551_s25, %s551_s25 }
   0xa   :  { %p660_p0 = scmp.ne.s32.totalorder %s551_s25, %s659_s26  ;;  %p665_p2 = scmp.lt.s32.totalorder %s659_s26, %s659_s26 }
   0xb   :  { %586 = vmatmul.mubr.msk.f32.vlgmr.msra.gmra.mrb[0].mxu0 %vm20_vm0, %v15_v7  ;;  %630 = vset.pattern.permute.xlu1 %v688_v8 }
   0xc   :  { %629 = vset.pattern.permute.xlu0 %v688_v8  ;;  %332 = vperm.xlu1 %630, %v17_v1   ;;  %p666_p3 = por %p665_p2, %p664_p1 }
   0xd   :  { %328 = vperm.xlu0 %629, %v16_v0  }
   0xe   :  { %p667_p4 = pnand %p666_p3, %p660_p0 }
  0x10   :  { %631 = vset.pattern.permute.xlu1 %v689_v9 }
  0x11   :  { %632 = vset.pattern.permute.xlu0 %v689_v9  ;;  %338 = vperm.xlu1 %631, %v16_v0  }
  0x12   :  { %342 = vperm.xlu0 %632, %v17_v1  }
  0x82   :  { %v319_v10 = vpop.permute.xlu1 %318  ;;  %v309_v12 = vpop.permute.xlu0 %308 }
  0x83   :  { %v315_v14 = vmul.f32 %v309_v12, %v738_v11  ;;  %v325_v17 = vmul.f32 %v319_v10, %v738_v11 }
  0x86   :  { %v323_v15 = vpop.permute.xlu1 %322  ;;  %v313_v16 = vpop.permute.xlu0 %312 }
  0x87   :  { %v326_v18 = vmul.f32 %v323_v15, %v743_v13  ;;  %v316_v19 = vmul.f32 %v313_v16, %v743_v13 }
  0x89   :  { %v633_v20 = vpack.i.bf16 %v316_v19, %v315_v14  ;;  %v638_v22 = vpack.i.bf16 %v326_v18, %v325_v17 }
  0x8b   :  { %v333_v21 = vpop.permute.xlu1 %332  ;;  %634 = vrot.lane.b32.xlu1 %v633_v20, %s690_s20 }
  0x8c   :  { %v336_v23 = vmul.f32 %v333_v21, %v743_v13  ;;  %v329_v24 = vpop.permute.xlu0 %328 }
  0x8d   :  { %v335_v25 = vmul.f32 %v329_v24, %v738_v11 }
  0x8f   :  { %v643_v26 = vpack.i.bf16 %v336_v23, %v335_v25  ;;  %639 = vrot.lane.b32.xlu1 %v638_v22, %s691_s2 }
  0x90   :  { %v339_v27 = vpop.permute.xlu1 %338 }
  0x91   :  { %v345_v28 = vmul.f32 %v339_v27, %v738_v11  ;;  %v343_v29 = vpop.permute.xlu0 %342  ;;  %644 = vrot.lane.b32.xlu0 %v643_v26, %s692_s21 }
  0x92   :  { %v346_v30 = vmul.f32 %v343_v29, %v743_v13 }
  0x94   :  { %v648_v31 = vpack.i.bf16 %v346_v30, %v345_v28 }
  0x96   :  { %649 = vrot.lane.b32.xlu1 %v648_v31, %s693_s22 }
  0xde   :  { %v756_v32 = vpop.f32.mrb[0].mxu0 }
  0xdf   :  { %v103_v33 = vand.u32 2139095040, %v756_v32  ;;  %v587_v34 = vpop.f32.mrb[1].mxu0  ;;  %v100_v38 = vand.u32 2147483647, %v756_v32  ;;  %vm102_vm14 = vcmp.lt.s32.totalorder %v756_v32, 0 }
  0xe1   :  { %v104_v35 = vshrl.u32 %v103_v33, 23  ;;  %v107_v41 = vand.u32 8388607, %v100_v38  ;;  %vm101_vm15 = vcmp.le.f32.partialorder %v100_v38, 0.7853982 }
  0xe3   :  { %v564_v36 = vadd.s32 4294967169, %v104_v35  ;;  %v108_v60 = vor.u32 8388608, %v107_v41 }
  0xe5   :  { %v110_v37 = vadd.s32 1, %v564_v36  ;;  %v148_v10 = vshll.u32 %v108_v60, 8 }
  0xe7   :  { %vm111_vm3 = vcmp.gt.s32.totalorder %v110_v37, 0 }
  0xe8   :  { %v112_v39 = vsel %vm111_vm3, %v110_v37, 0 }
  0xe9   :  { %v114_v40 = vand.u32 31, %v112_v39  ;;  %v113_v43 = vshrl.u32 %v112_v39, 5 }
  0xeb   :  { %v115_v42 = vsub.s32 32, %v114_v40  ;;  %v117_v45 = vshll.u32 %v694_v44, %v114_v40  ;;  %v120_v47 = vshll.u32 %v695_v46, %v114_v40  ;;  %v123_v51 = vshll.u32 %v696_v49, %v114_v40 }
  0xec   :  { %v126_v54 = vshll.u32 %v697_v52, %v114_v40  ;;  %v129_v57 = vshll.u32 %v698_v55, %v114_v40  ;;  %vm132_vm4 = vcmp.lt.s32.totalorder %v113_v43, 1  ;;  %vm135_vm5 = vcmp.lt.s32.totalorder %v113_v43, 4 }
  0xed   :  { %v118_v48 = vshrl.u32 %v695_v46, %v115_v42  ;;  %v121_v50 = vshrl.u32 %v696_v49, %v115_v42  ;;  %v124_v53 = vshrl.u32 %v697_v52, %v115_v42  ;;  %v127_v56 = vshrl.u32 %v698_v55, %v115_v42 }
  0xee   :  { %v130_v59 = vshrl.u32 %v699_v58, %v115_v42  ;;  %v116_v5 = vshrl.u32 %v694_v44, %v115_v42  ;;  %vm134_vm6 = vcmp.lt.s32.totalorder %v113_v43, 3  ;;  %vm133_vm7 = vcmp.lt.s32.totalorder %v113_v43, 2 }
  0xef   :  { %v119_v61 = vor.u32 %v118_v48, %v117_v45  ;;  %v122_v62 = vor.u32 %v121_v50, %v120_v47  ;;  %v125_v63 = vor.u32 %v124_v53, %v123_v51  ;;  %v128_v0 = vor.u32 %v127_v56, %v126_v54 }
  0xf0   :  { %v131_v1 = vor.u32 %v130_v59, %v129_v57 }
  0xf1   :  { %v137_v2 = vsel %vm135_vm5, %v125_v63, 2102212464  ;;  %v140_v3 = vsel %vm132_vm4, %v119_v61, %v122_v62  ;;  %v144_v4 = vsel %vm132_vm4, %v122_v62, %v125_v63  ;;  %v141_v6 = vsel %vm135_vm5, %v128_v0, 920167782 }
  0xf2   :  { %v145_v7 = vsel %vm135_vm5, %v131_v1, 1326507024  ;;  %v142_v8 = vsel %vm134_vm6, %v125_v63, %v141_v6  ;;  %v136_v12 = vsel %vm132_vm4, %v116_v5, %v119_v61  ;;  %v138_v14 = vsel %vm134_vm6, %v122_v62, %v137_v2 }
  0xf3   :  { %v146_v9 = vsel %vm134_vm6, %v128_v0, %v145_v7  ;;  %v143_v15 = vsel %vm133_vm7, %v140_v3, %v142_v8  ;;  %v139_v21 = vsel %vm133_vm7, %v136_v12, %v138_v14  ;;  %vm192_vm6 = vweird.f32 %v756_v32 }
  0xf4   :  { %v147_v16 = vsel %vm133_vm7, %v144_v4, %v146_v9  ;;  %v765_v19 = vmul.u32.u64.low %v148_v10, %v143_v15  ;;  %v766_v20 = vmul.u32.u64.high %v148_v10, %v143_v15, %v765_v19  ;;  %v155_v23 = vmul.u32 %v148_v10, %v139_v21 }
  0xf5   :  { %v762_v17 = vmul.u32.u64.low %v148_v10, %v147_v16  ;;  %v763_v18 = vmul.u32.u64.high %v148_v10, %v147_v16, %v762_v17 }
  0xf6   :  { %v158_v22 = vadd.s32 1, %v766_v20 }
  0xf7   :  { %vm157_vm8 = vc.u32 %v763_v18, %v765_v19  ;;  %v156_v56 = vadd.s32 %v765_v19, %v763_v18 }
  0xf8   :  { %v159_v24 = vsel %vm157_vm8, %v158_v22, %v766_v20 }
  0xf9   :  { %v160_v25 = vadd.s32 %v159_v24, %v155_v23 }
  0xfb   :  { %v161_v26 = vadd.s32 536870912, %v160_v25 }
  0xfd   :  { %v635_v27 = vpop.permute.xlu1 %634  ;;  %v162_v28 = vshrl.u32 %v161_v26, 30 }
  0xfe   :  { %v637_v29 = vunpack.i.h.bf16 %v635_v27  ;;  %v636_v30 = vunpack.i.l.bf16 %v635_v27 }
  0xff   :  { %v163_v31 = vshll.u32 %v162_v28, 30  ;;  %v186_v4 = vsub.s32 4, %v162_v28 }
 0x100   :  { %v381_v33 = vsel %vm379_vm9, %v743_v13, %v637_v29  ;;  %v380_v34 = vsel %vm379_vm9, %v738_v11, %v636_v30 }
 0x101   :  { %v640_v35 = vpop.permute.xlu1 %639  ;;  %v164_v36 = vsub.s32 %v160_v25, %v163_v31  ;;  %v187_v7 = vsel %vm102_vm14, %v186_v4, %v162_v28 }
 0x102   :  { %v642_v37 = vunpack.i.h.bf16 %v640_v35  ;;  %v641_v39 = vunpack.i.l.bf16 %v640_v35  ;;  %v189_v9 = vsel %vm101_vm15, 0, %v187_v7 }
 0x103   :  { %v645_v40 = vpop.permute.xlu0 %644  ;;  %v166_v43 = vsub.s32 0, %v164_v36  ;;  %v296_v10 = vadd.s32 3, %v189_v9  ;;  %v193_v12 = vand.u32 3, %v189_v9 }
 0x104   :  { %v647_v41 = vunpack.i.h.bf16 %v645_v40  ;;  %v646_v42 = vunpack.i.l.bf16 %v645_v40  ;;  %v383_v44 = vsel %vm382_vm10, %v380_v34, %v641_v39  ;;  %v384_v45 = vsel %vm382_vm10, %v381_v33, %v642_v37 }
 0x105   :  { %v565_v46 = vmin.u32 %v166_v43, %v164_v36  ;;  %v297_v14 = vand.u32 3, %v296_v10  ;;  %vm198_vm0 = vcmp.eq.s32.totalorder %v193_v12, 2  ;;  %vm195_vm2 = vcmp.eq.s32.totalorder %v193_v12, 0 }
 0x106   :  { %v386_v13 = vsel %vm385_vm11, %v383_v44, %v646_v42  ;;  %v387_v11 = vsel %vm385_vm11, %v384_v45, %v647_v41  ;;  %vm194_vm4 = vcmp.lt.s32.totalorder %v193_v12, 2 }
 0x107   :  { %v168_v48 = vclz %v565_v46  ;;  %vm302_vm1 = vcmp.eq.s32.totalorder %v297_v14, 2  ;;  %vm299_vm3 = vcmp.eq.s32.totalorder %v297_v14, 0  ;;  %vm298_vm5 = vcmp.lt.s32.totalorder %v297_v14, 2 }
 0x108   :  { %v650_v47 = vpop.permute.xlu1 %649 }
 0x109   :  { %v652_v49 = vunpack.i.h.bf16 %v650_v47  ;;  %v651_v50 = vunpack.i.l.bf16 %v650_v47  ;;  %v566_v51 = vadd.s32 4294967294, %v168_v48 }
 0x10b   :  { %v389_v52 = vsel %vm388_vm12, %v386_v13, %v651_v50  ;;  %v390_v53 = vsel %vm388_vm12, %v387_v11, %v652_v49  ;;  %vm567_vm13 = vcmp.lt.s32.totalorder %v566_v51, 0 }
 0x10c   :  { %v599_v54 = vpack.c.bf16 %v390_v53, %v389_v52  ;;  %v171_v55 = vsel %vm567_vm13, 0, %v566_v51 }
 0x10d   :  { %v172_v57 = vsub.s32 32, %v171_v55  ;;  %v176_v58 = vsub.s32 4294967266, %v171_v55  ;;  %v173_v59 = vshll.u32 %v164_v36, %v171_v55 }
 0x10e   :  { %600 = vmatprep.subr.bf16.mxu1 %v599_v54 }
 0x10f   :  { %602 = vmatpush3.bf16.msra.mxu1 %v599_v54  ;;  %v174_v60 = vshrl.u32 %v156_v56, %v172_v57  ;;  %v177_v61 = vadd.s32 127, %v176_v58 }
 0x111   :  { %v175_v62 = vor.u32 %v174_v60, %v173_v59  ;;  %v178_v63 = vshll.u32 %v177_v61, 23 }
 0x113   :  { %v179_v0 = vor.u32 4788187, %v178_v63  ;;  %v182_v2 = vcvt.s32.f32 %v175_v62 }
 0x115   :  { %v180_v1 = vand.u32 2147483647, %v179_v0 }
 0x117   :  { %v183_v3 = vmul.f32 %v182_v2, %v180_v1 }
 0x119   :  { %v184_v5 = vxor.u32 2147483648, %v183_v3 }
 0x11b   :  { %v185_v6 = vsel %vm102_vm14, %v184_v5, %v183_v3 }
 0x11c   :  { %v188_v8 = vsel %vm101_vm15, %v756_v32, %v185_v6 }
 0x11d   :  { %653 = vcosq.f32 %v188_v8 }
 0x11e   :  { %655 = vsinq.f32 %v188_v8 }
 0x127   :  { %v654_v15 = vpop.eup %653 }
 0x128   :  { %v656_v16 = vpop.eup %655  ;;  %v199_v17 = vxor.u32 2147483648, %v654_v15 }
 0x129   :  { %v196_v18 = vxor.u32 2147483648, %v656_v16 }
 0x12a   :  { %v200_v19 = vsel %vm198_vm0, %v199_v17, %v656_v16  ;;  %v304_v38 = vsel %vm302_vm1, %v199_v17, %v656_v16 }
 0x12b   :  { %v197_v20 = vsel %vm195_vm2, %v654_v15, %v196_v18  ;;  %v301_v21 = vsel %vm299_vm3, %v654_v15, %v196_v18 }
 0x12c   :  { %v201_v22 = vsel %vm194_vm4, %v197_v20, %v200_v19  ;;  %v305_v23 = vsel %vm298_vm5, %v301_v21, %v304_v38 }
 0x12d   :  { %v202_v24 = vsel %vm192_vm6, nan, %v201_v22  ;;  %v306_v25 = vsel %vm192_vm6, nan, %v305_v23 }
 0x12e   :  { %592 = vmatprep.mubr.msk.f32.mxu1 %vm382_vm10, %v202_v24 }
 0x12f   :  { %593 = vmatmul.mubr.msk.f32.vlgmr.msra.gmra.mrb[0].mxu1 %vm382_vm10, %v306_v25 }
 0x202   :  { %v594_v26 = vpop.f32.mrb[0].mxu1 }
 0x203   :  { %v473_v27 = vmul.f32 %v594_v26, %v594_v26  ;;  %490 = vrot.lane.b32.xlu1 %v594_v26, %s690_s20  ;;  %v463_v28 = vpop.f32.mrb[1].mxu1 }
 0x204   :  { %v472_v29 = vmul.f32 %v463_v28, %v463_v28  ;;  %477 = vrot.lane.b32.xlu0 %v463_v28, %s690_s20 }
 0x206   :  { %v474_v30 = vadd.f32 %v473_v27, %v472_v29 }
 0x207   :  { %493 = vrot.lane.b32.xlu1 %v594_v26, %s691_s2 }
 0x208   :  { %657 = vrcp.f32 %v474_v30  ;;  %480 = vrot.lane.b32.xlu0 %v463_v28, %s691_s2 }
 0x20b   :  { %496 = vrot.lane.b32.xlu1 %v594_v26, %s692_s21 }
 0x20c   :  { %483 = vrot.lane.b32.xlu0 %v463_v28, %s692_s21 }
 0x212   :  { %v658_v32 = vpop.eup %657 }
 0x213   :  { %506 = vrot.lane.b32.xlu1 %v658_v32, %s691_s2  ;;  %503 = vrot.lane.b32.xlu0 %v658_v32, %s690_s20 }
 0x217   :  { %509 = vrot.lane.b32.xlu0 %v658_v32, %s692_s21 }
 0x275   :  { %v491_v31 = vpop.permute.xlu1 %490 }
 0x276   :  { %v478_v33 = vpop.permute.xlu0 %477  ;;  %v499_v36 = vsel %vm379_vm9, %v594_v26, %v491_v31 }
 0x277   :  { %v486_v37 = vsel %vm379_vm9, %v463_v28, %v478_v33 }
 0x279   :  { %v494_v34 = vpop.permute.xlu1 %493 }
 0x27a   :  { %v481_v35 = vpop.permute.xlu0 %480  ;;  %v500_v39 = vsel %vm382_vm10, %v499_v36, %v494_v34 }
 0x27b   :  { %v487_v41 = vsel %vm382_vm10, %v486_v37, %v481_v35 }
 0x27d   :  { %v497_v40 = vpop.permute.xlu1 %496 }
 0x27e   :  { %v484_v42 = vpop.permute.xlu0 %483  ;;  %v501_v43 = vsel %vm385_vm11, %v500_v39, %v497_v40 }
 0x27f   :  { %521 = vrot.lane.b32.xlu0 %v501_v43, %s690_s20  ;;  %v488_v44 = vsel %vm385_vm11, %v487_v41, %v484_v42 }
 0x280   :  { %516 = vrot.lane.b32.xlu1 %v488_v44, %s690_s20 }
 0x285   :  { %v504_v45 = vpop.permute.xlu0 %503  ;;  %v507_v46 = vpop.permute.xlu1 %506 }
 0x286   :  { %v512_v47 = vsel %vm379_vm9, %v658_v32, %v504_v45 }
 0x287   :  { %v513_v11 = vsel %vm382_vm10, %v512_v47, %v507_v46 }
 0x289   :  { %v510_v13 = vpop.permute.xlu0 %509 }
 0x28a   :  { %v514_v48 = vsel %vm385_vm11, %v513_v11, %v510_v13 }
 0x28b   :  { %527 = vrot.lane.b32.xlu1 %v514_v48, %s690_s20 }
 0x2f1   :  { %v522_v49 = vpop.permute.xlu0 %521 }
 0x2f2   :  { %v524_v50 = vmul.f32 %v594_v26, %v522_v49  ;;  %v532_v51 = vmul.f32 %v522_v49, %v463_v28  ;;  %v517_v52 = vpop.permute.xlu1 %516 }
 0x2f3   :  { %v519_v53 = vmul.f32 %v517_v52, %v463_v28  ;;  %v531_v54 = vmul.f32 %v594_v26, %v517_v52 }
 0x2f5   :  { %v525_v55 = vadd.f32 %v524_v50, %v519_v53  ;;  %v533_v56 = vsub.f32 %v531_v54, %v532_v51 }
 0x2fd   :  { %v528_v57 = vpop.permute.xlu1 %527 }
 0x2fe   :  { %v530_v58 = vmul.f32 %v528_v57, %v525_v55  ;;  %v534_v59 = vmul.f32 %v533_v56, %v528_v57 }
 0x300   :  { %537 = vrot.lane.b32.xlu0 %v530_v58, %s700_s23  ;;  %539 = vrot.lane.b32.xlu1 %v534_v59, %s700_s23 }
 0x372   :  { %v538_v60 = vpop.permute.xlu0 %537  ;;  %v540_v61 = vpop.permute.xlu1 %539 }
 0x373   :  { %543 = vst.msk [vmem:[#allocation2] sm:$0xff] %vm388_vm12, %v538_v60  ;;  %544 = vst.msk [vmem:[#allocation2 + $0x8] sm:$0xff] %vm388_vm12, %v540_v61 }
 0x374   :  { %670 = shalt.err (!%p667_p4)
}
 0x375   :  { %s671_s29 = scalar_lea.hbm %s828_s3, 256 }
 0x376   :  { %p672_p5 = scmp.ne.s32.totalorder %s828_s3, %s671_s29  ;;  %p675_p6 = scmp.lt.u32.totalorder %s671_s29, %s828_s3 }
 0x378   :  { %p677_p7 = pnand %p675_p6, %p672_p5 }
 0x37a   :  { %680 = shalt.err (!%p677_p7)
}
 0x37b   :  { %s702_s7 = smov 128  }
 0x37c   :  { %556 = dma.vmem_to_hbm [thread:$0]  %s551_s25, 256, %s828_s3, [#allocation3], %s702_s7, %s702_s7, %s690_s20  }
 0x37d   :  { %681 = dma.done.wait [#allocation3], 256  }
 0x37e   :  { %682 = vsyncadd [#allocation3], 4294967040 }
 0x37f   :  { %560 = vsyncpa [#allocation3], 1 }

</bundles_post_ra>
